<compile_context>
chip_gen: v5e
topology: v5e:2x2
jax: 0.10.0
libtpu: 0.0.40
codegen_flags: <defaults>
</compile_context>

<pallas_src>
import numpy as np

import jax
import jax.numpy as jnp
from jax.experimental import pallas as pl
from jax.experimental.pallas import tpu as pltpu


# ----------------------------------------------------------------------------
# Kernel
# ----------------------------------------------------------------------------
def make_convblock_kernel(N, H, W, Cin, Cout, use_att):
    """Fused ConvBlock kernel for fixed (small) static shapes, slab layout."""
    WCIN = W * Cin
    WCOUT = W * Cout

    def kernel(x_ref,            # (N, H, W*Cin)        input slab, f32
               w1_ref,           # (3, W*Cin, W*Cout)   banded conv1 weight, bf16
               s1_ref, t1_ref,   # (1, W*Cout)          folded BN1 scale / bias (tiled)
               w2_ref,           # (3, W*Cout, W*Cout)  banded conv2 weight, bf16
               s2_ref, t2_ref,   # (1, W*Cout)
               fw1_ref, fb1_ref,  # (Cout, Cout), (1, Cout)  attention fc1
               fw2_ref, fb2_ref,  # (Cout, Cout), (1, Cout)  attention fc2
               out_ref):         # (N, H, W*Cout)       output slab, f32

        # ---------------- conv1: 3 banded matmuls (ky taps), batch merged in M ----
        x = x_ref[...].astype(jnp.bfloat16)                       # (N, H, W*Cin)
        zrow1 = jnp.zeros((N, 1, WCIN), jnp.bfloat16)
        xp = jnp.concatenate([zrow1, x, zrow1], axis=1)           # (N, H+2, W*Cin)

        acc1 = jnp.zeros((N * H, WCOUT), jnp.float32)
        for ky in range(3):                                       # 3 fat dots
            rows = xp[:, ky:ky + H, :].reshape(N * H, WCIN)
            acc1 = acc1 + jnp.dot(rows, w1_ref[ky],
                                  preferred_element_type=jnp.float32)
        # folded (conv bias + eval-mode BN) + ReLU, fully lane-dense epilogue
        y1 = jnp.maximum(acc1 * s1_ref[...] + t1_ref[...], 0.0)   # (N*H, W*Cout)

        # ---------------- conv2 ---------------------------------------------------
        zrow2 = jnp.zeros((N, 1, WCOUT), jnp.bfloat16)
        y1p = jnp.concatenate(
            [zrow2, y1.astype(jnp.bfloat16).reshape(N, H, WCOUT), zrow2],
            axis=1)                                               # (N, H+2, W*Cout)

        acc2 = jnp.zeros((N * H, WCOUT), jnp.float32)
        for ky in range(3):
            rows = y1p[:, ky:ky + H, :].reshape(N * H, WCOUT)
            acc2 = acc2 + jnp.dot(rows, w2_ref[ky],
                                  preferred_element_type=jnp.float32)
        y2 = jnp.maximum(acc2 * s2_ref[...] + t2_ref[...], 0.0)   # (N*H, W*Cout)
        y2 = y2.reshape(N, H, WCOUT)

        # ---------------- AttentionBlock: GAP -> FC -> ReLU -> FC -> sigmoid ------
        if use_att:
            gap = jnp.sum(y2, axis=1)                             # (N, W*Cout)
            gap = jnp.sum(gap.reshape(N, W, Cout), axis=1) * (1.0 / (H * W))
            h = jnp.maximum(
                jnp.dot(gap, fw1_ref[...],
                        preferred_element_type=jnp.float32) + fb1_ref[...], 0.0)
            z = jnp.dot(h, fw2_ref[...],
                        preferred_element_type=jnp.float32) + fb2_ref[...]
            att = jax.nn.sigmoid(z)                               # (N, Cout)
            # tile per-channel gate to lane width -> lane-dense scale
            y2 = y2 * jnp.tile(att, (1, W))[:, None, :]

        out_ref[...] = y2.astype(out_ref.dtype)                   # dense (N,H,128) store

    return kernel


# ----------------------------------------------------------------------------
# Host-side parameter packing (banded weights, folded + tiled scale/bias)
# ----------------------------------------------------------------------------
def _band_from_hwio(w_hwio, W):
    """(3,3,Cin,Cout) HWIO -> (3, W*Cin, W*Cout) block-banded weights.

    For each ky, band[ky][(j+kx-1)*Cin + ci, j*Cout + co] = w[ky, kx, ci, co];
    out-of-range kx taps are dropped (== 'SAME' zero padding along W).
    """
    w = np.asarray(w_hwio, np.float32)
    _, _, Cin, Cout = w.shape
    band = np.zeros((3, W * Cin, W * Cout), np.float32)
    for ky in range(3):
        for kx in range(3):
            for j in range(W):
                jin = j + kx - 1
                if 0 <= jin < W:
                    band[ky, jin * Cin:(jin + 1) * Cin,
                         j * Cout:(j + 1) * Cout] = w[ky, kx]
    return jnp.asarray(band)


def _pack_params(params, W):
    """Fold conv bias into BN bias, tile scale/bias to lane width, band weights."""
    t1f = params["t1"] + params["b1"] * params["s1"]   # (1, Cout)
    t2f = params["t2"] + params["b2"] * params["s2"]
    return dict(
        w1b=_band_from_hwio(params["w1"], W).astype(jnp.bfloat16),
        w2b=_band_from_hwio(params["w2"], W).astype(jnp.bfloat16),
        s1t=jnp.tile(params["s1"], (1, W)).astype(jnp.float32),
        t1t=jnp.tile(t1f, (1, W)).astype(jnp.float32),
        s2t=jnp.tile(params["s2"], (1, W)).astype(jnp.float32),
        t2t=jnp.tile(t2f, (1, W)).astype(jnp.float32),
        fw1=params["fw1"].astype(jnp.float32), fb1=params["fb1"].astype(jnp.float32),
        fw2=params["fw2"].astype(jnp.float32), fb2=params["fb2"].astype(jnp.float32),
    )


# ----------------------------------------------------------------------------
# Public wrapper (NCHW in / NCHW out, PyTorch convention)
# ----------------------------------------------------------------------------
def conv_block_forward(x_nchw, params, use_att=True):
    N, Cin, H, W = x_nchw.shape
    Cout = params["w1"].shape[-1]

    packed = _pack_params(params, W)

    # NCHW -> NHWC -> lane-dense slab (N, H, W*Cin); no host-side padding.
    x_slab = jnp.transpose(x_nchw, (0, 2, 3, 1)).astype(jnp.float32)
    x_slab = x_slab.reshape(N, H, W * Cin)

    kernel = make_convblock_kernel(N, H, W, Cin, Cout, use_att)

    args = (x_slab,
            packed["w1b"], packed["s1t"], packed["t1t"],
            packed["w2b"], packed["s2t"], packed["t2t"],
            packed["fw1"], packed["fb1"], packed["fw2"], packed["fb2"])

    vmem = pl.BlockSpec(memory_space=pltpu.MemorySpace.VMEM)
    out_slab = pl.pallas_call(
        kernel,
        out_shape=jax.ShapeDtypeStruct((N, H, W * Cout), jnp.float32),
        in_specs=[vmem] * len(args),
        out_specs=vmem,
    )(*args)

    out_nhwc = out_slab.reshape(N, H, W, Cout)
    return jnp.transpose(out_nhwc, (0, 3, 1, 2))   # back to NCHW


# ----------------------------------------------------------------------------
# Synthetic parameters (PyTorch-analogous shapes) and plain-JAX reference
# ----------------------------------------------------------------------------
def init_params(key, Cin, Cout, eps=1e-5):
    ks = jax.random.split(key, 16)
    f32 = jnp.float32

    def n(k, shape, scale=1.0):
        return scale * jax.random.normal(k, shape, f32)

    conv1_w = n(ks[0], (Cout, Cin, 3, 3), (Cin * 9) ** -0.5)   # torch OIHW
    conv1_b = n(ks[1], (Cout,), 0.1)
    conv2_w = n(ks[2], (Cout, Cout, 3, 3), (Cout * 9) ** -0.5)
    conv2_b = n(ks[3], (Cout,), 0.1)

    def bn_fold(kg, kb, km, kv):
        gamma = 1.0 + 0.1 * jax.random.normal(kg, (Cout,), f32)
        beta = 0.1 * jax.random.normal(kb, (Cout,), f32)
        mean = 0.1 * jax.random.normal(km, (Cout,), f32)
        var = 0.5 + jnp.abs(jax.random.normal(kv, (Cout,), f32)) * 0.5
        scale = gamma / jnp.sqrt(var + eps)
        bias = beta - mean * scale
        return scale, bias

    s1, t1 = bn_fold(ks[4], ks[5], ks[6], ks[7])
    s2, t2 = bn_fold(ks[8], ks[9], ks[10], ks[11])

    fc1_w = n(ks[12], (Cout, Cout), Cout ** -0.5)   # torch Linear (out, in)
    fc1_b = n(ks[13], (Cout,), 0.1)
    fc2_w = n(ks[14], (Cout, Cout), Cout ** -0.5)
    fc2_b = n(ks[15], (Cout,), 0.1)

    return {
        "w1": jnp.transpose(conv1_w, (2, 3, 1, 0)),   # HWIO
        "b1": conv1_b.reshape(1, Cout),
        "s1": s1.reshape(1, Cout), "t1": t1.reshape(1, Cout),
        "w2": jnp.transpose(conv2_w, (2, 3, 1, 0)),
        "b2": conv2_b.reshape(1, Cout),
        "s2": s2.reshape(1, Cout), "t2": t2.reshape(1, Cout),
        "fw1": fc1_w.T, "fb1": fc1_b.reshape(1, Cout),
        "fw2": fc2_w.T, "fb2": fc2_b.reshape(1, Cout),
    }


def reference_forward(x_nchw, params, use_att=True):
    """Plain-JAX reference (same bf16-operand / f32-accumulate conv precision)."""
    x = jnp.transpose(x_nchw, (0, 2, 3, 1)).astype(jnp.float32)   # NHWC

    def conv3x3(inp, w, b):
        y = jax.lax.conv_general_dilated(
            inp.astype(jnp.bfloat16), w.astype(jnp.bfloat16),
            window_strides=(1, 1), padding="SAME",
            dimension_numbers=("NHWC", "HWIO", "NHWC"),
            preferred_element_type=jnp.float32)
        return y + b.reshape(1, 1, 1, -1)

    y = conv3x3(x, params["w1"], params["b1"][0])
    y = jnp.maximum(y * params["s1"][0] + params["t1"][0], 0.0)
    y = conv3x3(y, params["w2"], params["b2"][0])
    y = jnp.maximum(y * params["s2"][0] + params["t2"][0], 0.0)
    if use_att:
        gap = jnp.mean(y, axis=(1, 2))                               # (N, C)
        h = jnp.maximum(gap @ params["fw1"] + params["fb1"], 0.0)
        att = jax.nn.sigmoid(h @ params["fw2"] + params["fb2"])
        y = y * att[:, None, None, :]
    return jnp.transpose(y, (0, 3, 1, 2))                            # NCHW


if __name__ == "__main__":
    key = jax.random.PRNGKey(0)
    k_x, k_p = jax.random.split(key)

    N, Cin, H, W = 2, 4, 16, 16
    Cout = 8                       # W * Cout = 128 -> exactly one lane group
    use_att = True                 # exercise the AttentionBlock path as well

    x = jax.random.normal(k_x, (N, Cin, H, W), jnp.float32)
    params = init_params(k_p, Cin, Cout)

    out = jax.block_until_ready(conv_block_forward(x, params, use_att=use_att))
    ref = jax.block_until_ready(reference_forward(x, params, use_att=use_att))

    assert out.shape == (N, Cout, H, W)
    assert jnp.allclose(out, ref, rtol=1e-2, atol=1e-2), "mismatch vs JAX reference"

    print("KERNEL_OK")
</pallas_src>

<mosaic_0001>
module attributes {stable_mosaic.version = 11 : i64} {
  func.func @kernel(%arg0: memref<2x16x64xf32, #tpu.memory_space<vmem>>, %arg1: memref<3x64x128xbf16, #tpu.memory_space<vmem>>, %arg2: memref<1x128xf32, #tpu.memory_space<vmem>>, %arg3: memref<1x128xf32, #tpu.memory_space<vmem>>, %arg4: memref<3x128x128xbf16, #tpu.memory_space<vmem>>, %arg5: memref<1x128xf32, #tpu.memory_space<vmem>>, %arg6: memref<1x128xf32, #tpu.memory_space<vmem>>, %arg7: memref<8x8xf32, #tpu.memory_space<vmem>>, %arg8: memref<1x8xf32, #tpu.memory_space<vmem>>, %arg9: memref<8x8xf32, #tpu.memory_space<vmem>>, %arg10: memref<1x8xf32, #tpu.memory_space<vmem>>, %arg11: memref<2x16x128xf32, #tpu.memory_space<vmem>>) attributes {dimension_semantics = [], scalar_prefetch = 0 : i64, scratch_operands = 0 : i64, tpu.core_type = #tpu.core_type<tc>} {
    %c0 = arith.constant 0 : index
    %c0_0 = arith.constant 0 : index
    %c0_1 = arith.constant 0 : index
    %0 = vector.load %arg0[%c0, %c0_0, %c0_1] : memref<2x16x64xf32, #tpu.memory_space<vmem>>, vector<2x16x64xf32>
    %1 = arith.truncf %0 : vector<2x16x64xf32> to vector<2x16x64xbf16>
    %cst = arith.constant 0.000000e+00 : bf16
    %2 = vector.broadcast %cst : bf16 to vector<2x1x64xbf16>
    %3 = tpu.concatenate %2, %1, %2 in 1 : vector<2x1x64xbf16>, vector<2x16x64xbf16>, vector<2x1x64xbf16> -> vector<2x18x64xbf16>
    %cst_2 = arith.constant 0.000000e+00 : f32
    %4 = vector.broadcast %cst_2 : f32 to vector<32x128xf32>
    %5 = vector.extract_strided_slice %3 {offsets = [0, 0, 0], sizes = [2, 16, 64], strides = [1, 1, 1]} : vector<2x18x64xbf16> to vector<2x16x64xbf16>
    %6 = vector.shape_cast %5 : vector<2x16x64xbf16> to vector<32x64xbf16>
    %c0_3 = arith.constant 0 : index
    %c0_4 = arith.constant 0 : index
    %c0_5 = arith.constant 0 : index
    %7 = vector.load %arg1[%c0_3, %c0_4, %c0_5] : memref<3x64x128xbf16, #tpu.memory_space<vmem>>, vector<1x64x128xbf16>
    %8 = vector.shape_cast %7 : vector<1x64x128xbf16> to vector<64x128xbf16>
    %cst_6 = arith.constant dense<0.000000e+00> : vector<32x128xf32>
    %9 = tpu.matmul %6, %8, %cst_6 {dimension_numbers = #tpu.dot_dimension_numbers<[1], [0], [0], [1], [0, 0, 1, 1], [], []>} : vector<32x64xbf16>, vector<64x128xbf16>, vector<32x128xf32> -> vector<32x128xf32>
    %10 = arith.addf %4, %9 : vector<32x128xf32>
    %11 = vector.extract_strided_slice %3 {offsets = [0, 1, 0], sizes = [2, 16, 64], strides = [1, 1, 1]} : vector<2x18x64xbf16> to vector<2x16x64xbf16>
    %12 = vector.shape_cast %11 : vector<2x16x64xbf16> to vector<32x64xbf16>
    %c1 = arith.constant 1 : index
    %c0_7 = arith.constant 0 : index
    %c0_8 = arith.constant 0 : index
    %13 = vector.load %arg1[%c1, %c0_7, %c0_8] : memref<3x64x128xbf16, #tpu.memory_space<vmem>>, vector<1x64x128xbf16>
    %14 = vector.shape_cast %13 : vector<1x64x128xbf16> to vector<64x128xbf16>
    %cst_9 = arith.constant dense<0.000000e+00> : vector<32x128xf32>
    %15 = tpu.matmul %12, %14, %cst_9 {dimension_numbers = #tpu.dot_dimension_numbers<[1], [0], [0], [1], [0, 0, 1, 1], [], []>} : vector<32x64xbf16>, vector<64x128xbf16>, vector<32x128xf32> -> vector<32x128xf32>
    %16 = arith.addf %10, %15 : vector<32x128xf32>
    %17 = vector.extract_strided_slice %3 {offsets = [0, 2, 0], sizes = [2, 16, 64], strides = [1, 1, 1]} : vector<2x18x64xbf16> to vector<2x16x64xbf16>
    %18 = vector.shape_cast %17 : vector<2x16x64xbf16> to vector<32x64xbf16>
    %c2 = arith.constant 2 : index
    %c0_10 = arith.constant 0 : index
    %c0_11 = arith.constant 0 : index
    %19 = vector.load %arg1[%c2, %c0_10, %c0_11] : memref<3x64x128xbf16, #tpu.memory_space<vmem>>, vector<1x64x128xbf16>
    %20 = vector.shape_cast %19 : vector<1x64x128xbf16> to vector<64x128xbf16>
    %cst_12 = arith.constant dense<0.000000e+00> : vector<32x128xf32>
    %21 = tpu.matmul %18, %20, %cst_12 {dimension_numbers = #tpu.dot_dimension_numbers<[1], [0], [0], [1], [0, 0, 1, 1], [], []>} : vector<32x64xbf16>, vector<64x128xbf16>, vector<32x128xf32> -> vector<32x128xf32>
    %22 = arith.addf %16, %21 : vector<32x128xf32>
    %c0_13 = arith.constant 0 : index
    %c0_14 = arith.constant 0 : index
    %23 = vector.load %arg2[%c0_13, %c0_14] : memref<1x128xf32, #tpu.memory_space<vmem>>, vector<1x128xf32>
    %24 = vector.broadcast %23 : vector<1x128xf32> to vector<32x128xf32>
    %25 = arith.mulf %22, %24 : vector<32x128xf32>
    %c0_15 = arith.constant 0 : index
    %c0_16 = arith.constant 0 : index
    %26 = vector.load %arg3[%c0_15, %c0_16] : memref<1x128xf32, #tpu.memory_space<vmem>>, vector<1x128xf32>
    %27 = vector.broadcast %26 : vector<1x128xf32> to vector<32x128xf32>
    %28 = arith.addf %25, %27 : vector<32x128xf32>
    %cst_17 = arith.constant 0.000000e+00 : f32
    %29 = vector.broadcast %cst_17 : f32 to vector<32x128xf32>
    %30 = arith.maximumf %28, %29 : vector<32x128xf32>
    %cst_18 = arith.constant 0.000000e+00 : bf16
    %31 = vector.broadcast %cst_18 : bf16 to vector<2x1x128xbf16>
    %32 = arith.truncf %30 : vector<32x128xf32> to vector<32x128xbf16>
    %33 = vector.shape_cast %32 : vector<32x128xbf16> to vector<2x16x128xbf16>
    %34 = tpu.concatenate %31, %33, %31 in 1 : vector<2x1x128xbf16>, vector<2x16x128xbf16>, vector<2x1x128xbf16> -> vector<2x18x128xbf16>
    %cst_19 = arith.constant 0.000000e+00 : f32
    %35 = vector.broadcast %cst_19 : f32 to vector<32x128xf32>
    %36 = vector.extract_strided_slice %34 {offsets = [0, 0, 0], sizes = [2, 16, 128], strides = [1, 1, 1]} : vector<2x18x128xbf16> to vector<2x16x128xbf16>
    %37 = vector.shape_cast %36 : vector<2x16x128xbf16> to vector<32x128xbf16>
    %c0_20 = arith.constant 0 : index
    %c0_21 = arith.constant 0 : index
    %c0_22 = arith.constant 0 : index
    %38 = vector.load %arg4[%c0_20, %c0_21, %c0_22] : memref<3x128x128xbf16, #tpu.memory_space<vmem>>, vector<1x128x128xbf16>
    %39 = vector.shape_cast %38 : vector<1x128x128xbf16> to vector<128x128xbf16>
    %cst_23 = arith.constant dense<0.000000e+00> : vector<32x128xf32>
    %40 = tpu.matmul %37, %39, %cst_23 {dimension_numbers = #tpu.dot_dimension_numbers<[1], [0], [0], [1], [0, 0, 1, 1], [], []>} : vector<32x128xbf16>, vector<128x128xbf16>, vector<32x128xf32> -> vector<32x128xf32>
    %41 = arith.addf %35, %40 : vector<32x128xf32>
    %42 = vector.extract_strided_slice %34 {offsets = [0, 1, 0], sizes = [2, 16, 128], strides = [1, 1, 1]} : vector<2x18x128xbf16> to vector<2x16x128xbf16>
    %43 = vector.shape_cast %42 : vector<2x16x128xbf16> to vector<32x128xbf16>
    %c1_24 = arith.constant 1 : index
    %c0_25 = arith.constant 0 : index
    %c0_26 = arith.constant 0 : index
    %44 = vector.load %arg4[%c1_24, %c0_25, %c0_26] : memref<3x128x128xbf16, #tpu.memory_space<vmem>>, vector<1x128x128xbf16>
    %45 = vector.shape_cast %44 : vector<1x128x128xbf16> to vector<128x128xbf16>
    %cst_27 = arith.constant dense<0.000000e+00> : vector<32x128xf32>
    %46 = tpu.matmul %43, %45, %cst_27 {dimension_numbers = #tpu.dot_dimension_numbers<[1], [0], [0], [1], [0, 0, 1, 1], [], []>} : vector<32x128xbf16>, vector<128x128xbf16>, vector<32x128xf32> -> vector<32x128xf32>
    %47 = arith.addf %41, %46 : vector<32x128xf32>
    %48 = vector.extract_strided_slice %34 {offsets = [0, 2, 0], sizes = [2, 16, 128], strides = [1, 1, 1]} : vector<2x18x128xbf16> to vector<2x16x128xbf16>
    %49 = vector.shape_cast %48 : vector<2x16x128xbf16> to vector<32x128xbf16>
    %c2_28 = arith.constant 2 : index
    %c0_29 = arith.constant 0 : index
    %c0_30 = arith.constant 0 : index
    %50 = vector.load %arg4[%c2_28, %c0_29, %c0_30] : memref<3x128x128xbf16, #tpu.memory_space<vmem>>, vector<1x128x128xbf16>
    %51 = vector.shape_cast %50 : vector<1x128x128xbf16> to vector<128x128xbf16>
    %cst_31 = arith.constant dense<0.000000e+00> : vector<32x128xf32>
    %52 = tpu.matmul %49, %51, %cst_31 {dimension_numbers = #tpu.dot_dimension_numbers<[1], [0], [0], [1], [0, 0, 1, 1], [], []>} : vector<32x128xbf16>, vector<128x128xbf16>, vector<32x128xf32> -> vector<32x128xf32>
    %53 = arith.addf %47, %52 : vector<32x128xf32>
    %c0_32 = arith.constant 0 : index
    %c0_33 = arith.constant 0 : index
    %54 = vector.load %arg5[%c0_32, %c0_33] : memref<1x128xf32, #tpu.memory_space<vmem>>, vector<1x128xf32>
    %55 = vector.broadcast %54 : vector<1x128xf32> to vector<32x128xf32>
    %56 = arith.mulf %53, %55 : vector<32x128xf32>
    %c0_34 = arith.constant 0 : index
    %c0_35 = arith.constant 0 : index
    %57 = vector.load %arg6[%c0_34, %c0_35] : memref<1x128xf32, #tpu.memory_space<vmem>>, vector<1x128xf32>
    %58 = vector.broadcast %57 : vector<1x128xf32> to vector<32x128xf32>
    %59 = arith.addf %56, %58 : vector<32x128xf32>
    %cst_36 = arith.constant 0.000000e+00 : f32
    %60 = vector.broadcast %cst_36 : f32 to vector<32x128xf32>
    %61 = arith.maximumf %59, %60 : vector<32x128xf32>
    %62 = vector.shape_cast %61 : vector<32x128xf32> to vector<2x16x128xf32>
    %cst_37 = arith.constant dense<0.000000e+00> : vector<2x128xf32>
    %63 = vector.multi_reduction <add>, %62, %cst_37 [1] : vector<2x16x128xf32> to vector<2x128xf32>
    %64 = vector.shape_cast %63 : vector<2x128xf32> to vector<2x16x8xf32>
    %cst_38 = arith.constant dense<0.000000e+00> : vector<2x8xf32>
    %65 = vector.multi_reduction <add>, %64, %cst_38 [1] : vector<2x16x8xf32> to vector<2x8xf32>
    %cst_39 = arith.constant 3.906250e-03 : f32
    %66 = vector.broadcast %cst_39 : f32 to vector<2x8xf32>
    %67 = arith.mulf %65, %66 : vector<2x8xf32>
    %c0_40 = arith.constant 0 : index
    %c0_41 = arith.constant 0 : index
    %68 = vector.load %arg7[%c0_40, %c0_41] : memref<8x8xf32, #tpu.memory_space<vmem>>, vector<8x8xf32>
    %cst_42 = arith.constant dense<0.000000e+00> : vector<2x8xf32>
    %69 = tpu.matmul %67, %68, %cst_42 {dimension_numbers = #tpu.dot_dimension_numbers<[1], [0], [0], [1], [0, 0, 1, 1], [], []>} : vector<2x8xf32>, vector<8x8xf32>, vector<2x8xf32> -> vector<2x8xf32>
    %c0_43 = arith.constant 0 : index
    %c0_44 = arith.constant 0 : index
    %70 = vector.load %arg8[%c0_43, %c0_44] : memref<1x8xf32, #tpu.memory_space<vmem>>, vector<1x8xf32>
    %71 = vector.broadcast %70 : vector<1x8xf32> to vector<2x8xf32>
    %72 = arith.addf %69, %71 : vector<2x8xf32>
    %cst_45 = arith.constant 0.000000e+00 : f32
    %73 = vector.broadcast %cst_45 : f32 to vector<2x8xf32>
    %74 = arith.maximumf %72, %73 : vector<2x8xf32>
    %c0_46 = arith.constant 0 : index
    %c0_47 = arith.constant 0 : index
    %75 = vector.load %arg9[%c0_46, %c0_47] : memref<8x8xf32, #tpu.memory_space<vmem>>, vector<8x8xf32>
    %cst_48 = arith.constant dense<0.000000e+00> : vector<2x8xf32>
    %76 = tpu.matmul %74, %75, %cst_48 {dimension_numbers = #tpu.dot_dimension_numbers<[1], [0], [0], [1], [0, 0, 1, 1], [], []>} : vector<2x8xf32>, vector<8x8xf32>, vector<2x8xf32> -> vector<2x8xf32>
    %c0_49 = arith.constant 0 : index
    %c0_50 = arith.constant 0 : index
    %77 = vector.load %arg10[%c0_49, %c0_50] : memref<1x8xf32, #tpu.memory_space<vmem>>, vector<1x8xf32>
    %78 = vector.broadcast %77 : vector<1x8xf32> to vector<2x8xf32>
    %79 = arith.addf %76, %78 : vector<2x8xf32>
    %80 = arith.negf %79 : vector<2x8xf32>
    %81 = math.exp %80 : vector<2x8xf32>
    %cst_51 = arith.constant 1.000000e+00 : f32
    %82 = vector.broadcast %cst_51 : f32 to vector<2x8xf32>
    %83 = arith.addf %82, %81 : vector<2x8xf32>
    %84 = arith.divf %82, %83 : vector<2x8xf32>
    %85 = tpu.concatenate %84, %84, %84, %84, %84, %84, %84, %84, %84, %84, %84, %84, %84, %84, %84, %84 in 1 : vector<2x8xf32>, vector<2x8xf32>, vector<2x8xf32>, vector<2x8xf32>, vector<2x8xf32>, vector<2x8xf32>, vector<2x8xf32>, vector<2x8xf32>, vector<2x8xf32>, vector<2x8xf32>, vector<2x8xf32>, vector<2x8xf32>, vector<2x8xf32>, vector<2x8xf32>, vector<2x8xf32>, vector<2x8xf32> -> vector<2x128xf32>
    %86 = vector.shape_cast %85 : vector<2x128xf32> to vector<2x1x128xf32>
    %87 = vector.broadcast %86 : vector<2x1x128xf32> to vector<2x16x128xf32>
    %88 = arith.mulf %62, %87 : vector<2x16x128xf32>
    %c0_52 = arith.constant 0 : index
    %c0_53 = arith.constant 0 : index
    %c0_54 = arith.constant 0 : index
    %89 = vector.load %arg11[%c0_52, %c0_53, %c0_54] : memref<2x16x128xf32, #tpu.memory_space<vmem>>, vector<2x16x128xf32>
    tpu.vector_store %arg11[%c0_52, %c0_53, %c0_54], %88 {strides = array<i32>} : memref<2x16x128xf32, #tpu.memory_space<vmem>>, vector<2x16x128xf32>,
    return
  }
}

</mosaic_0001>

<bundles_post_ra>
// kernel: tpu_custom_call.1
= control target key start
LH: loop header
LB: loop body
LE: loop exit
PB: predicated region body
PF: predicated region fallthrough
CT: control target
= control target key end

     0   :  { %16 = vsyncpa [#allocation3], 0  ;;  %s2010_s0 = inlined_call_operand.hbm [shape: f32[2,16,64], index: 0, kind: input, shape index: {}]   ;;  %s2011_s1 = inlined_call_operand.hbm [shape: bf16[3,64,128], index: 1, kind: input, shape index: {}]   ;;  %s2012_s2 = inlined_call_operand.hbm [shape: f32[1,128], index: 2, kind: input, shape index: {}]   ;;  %s2013_s3 = inlined_call_operand.hbm [shape: f32[1,128], index: 3, kind: input, shape index: {}]   ;;  %s2014_s4 = inlined_call_operand.hbm [shape: bf16[3,128,128], index: 4, kind: input, shape index: {}]   ;;  %s2015_s5 = inlined_call_operand.hbm [shape: f32[1,128], index: 5, kind: input, shape index: {}]   ;;  %s2016_s6 = inlined_call_operand.hbm [shape: f32[1,128], index: 6, kind: input, shape index: {}]   ;;  %s2017_s7 = inlined_call_operand.hbm [shape: f32[8,8], index: 7, kind: input, shape index: {}]   ;;  %s2018_s8 = inlined_call_operand.hbm [shape: f32[1,8], index: 8, kind: input, shape index: {}]   ;;  %s2019_s9 = inlined_call_operand.vmem [shape: f32[8,8], index: 9, kind: input, shape index: {}]   ;;  %s2020_s10 = inlined_call_operand.vmem [shape: f32[1,8], index: 10, kind: input, shape index: {}]   ;;  %s2021_s11 = inlined_call_operand.hbm [shape: f32[2,16,128], index: 11, kind: output, shape index: {}]  }
   0x1   :  { %17 = vsyncpa [#allocation6], 0 }
   0x2   :  { %18 = vsyncpa [#allocation9], 0 }
   0x3   :  { %19 = vsyncpa [#allocation12], 0 }
   0x4   :  { %20 = vsyncpa [#allocation15], 0  ;;  %s39_s19 = sshll.u32 %s2011_s1, 4  ;;  %s40_s19 = int_to_ptr.hbm [resolvable:$true] %s39_s19 }
   0x5   :  { %21 = vsyncpa [#allocation4], 0  ;;  %s1688_s20 = smov [#allocation5]   ;;  %s64_s24 = sshll.u32 %s2013_s3, 4  ;;  %s65_s24 = int_to_ptr.hbm [resolvable:$true] %s64_s24 }
   0x6   :  { %s41_s21 = sshll.u32 %s1688_s20, 4  ;;  %s1689_s25 = smov 64   ;;  %s42_s21 = int_to_ptr.vmem [resolvable:$true] %s41_s21 }
   0x7   :  { %s1690_s26 = smov 4   ;;  %s1691_s27 = smov [#allocation8]  }
   0x8   :  { %47 = dma.hbm_to_vmem [thread:$0]  %s40_s19, 1536, %s42_s21, [#allocation6], %s1689_s25, %s1689_s25, %s1690_s26  }
   0x9   :  { %s66_s28 = sshll.u32 %s1691_s27, 4  ;;  %s88_s30 = sshll.u32 %s2015_s5, 4  ;;  %s67_s28 = int_to_ptr.vmem [resolvable:$true] %s66_s28  ;;  %s89_s30 = int_to_ptr.hbm [resolvable:$true] %s88_s30 }
   0xa   :  { %69 = dma.hbm_to_vmem [thread:$0]  %s65_s24, 16, %s67_s28, [#allocation9]  }
   0xb   :  { %s110_s3 = sshll.u32 %s2017_s7, 4  ;;  %s1692_s14 = smov [#allocation11]   ;;  %s111_s3 = int_to_ptr.hbm [resolvable:$true] %s110_s3 }
   0xc   :  { %s90_s15 = sshll.u32 %s1692_s14, 4  ;;  %s1693_s16 = smov [#allocation14]   ;;  %s91_s15 = int_to_ptr.vmem [resolvable:$true] %s90_s15 }
   0xd   :  { %93 = dma.hbm_to_vmem [thread:$0]  %s89_s30, 16, %s91_s15, [#allocation12]  }
   0xe   :  { %s112_s17 = sshll.u32 %s1693_s16, 4  ;;  %s26_s20 = sshll.u32 %s2010_s0, 4  ;;  %s113_s17 = int_to_ptr.vmem [resolvable:$true] %s112_s17  ;;  %s27_s20 = int_to_ptr.hbm [resolvable:$true] %s26_s20 }
   0xf   :  { %115 = dma.hbm_to_vmem [thread:$0]  %s111_s3, 128, %s113_s17, [#allocation15]  }
  0x10   :  { %s1694_s5 = smov [#allocation2]   ;;  %s53_s7 = sshll.u32 %s2012_s2, 4  ;;  %s54_s7 = int_to_ptr.hbm [resolvable:$true] %s53_s7 }
  0x11   :  { %s28_s21 = sshll.u32 %s1694_s5, 4  ;;  %s1695_s24 = smov 128   ;;  %s29_s21 = int_to_ptr.vmem [resolvable:$true] %s28_s21 }
  0x12   :  { %s1696_s27 = smov 8   ;;  %s1697_s28 = smov [#allocation7]  }
  0x13   :  { %34 = dma.hbm_to_vmem [thread:$0]  %s27_s20, 512, %s29_s21, [#allocation3], %s1695_s24, %s1695_s24, %s1696_s27  }
  0x14   :  { %s55_s29 = sshll.u32 %s1697_s28, 4  ;;  %s74_s30 = sshll.u32 %s2014_s4, 4  ;;  %s56_s29 = int_to_ptr.vmem [resolvable:$true] %s55_s29  ;;  %s75_s30 = int_to_ptr.hbm [resolvable:$true] %s74_s30 }
  0x15   :  { %58 = dma.hbm_to_vmem [thread:$0]  %s54_s7, 16, %s56_s29, [#allocation6]  }
  0x16   :  { %s99_s2 = sshll.u32 %s2016_s6, 4  ;;  %s1698_s3 = smov [#allocation10]   ;;  %s100_s2 = int_to_ptr.hbm [resolvable:$true] %s99_s2 }
  0x17   :  { %s76_s14 = sshll.u32 %s1698_s3, 4  ;;  %s1699_s15 = smov [#allocation13]   ;;  %s77_s14 = int_to_ptr.vmem [resolvable:$true] %s76_s14 }
  0x18   :  { %82 = dma.hbm_to_vmem [thread:$0]  %s75_s30, 3072, %s77_s14, [#allocation9], %s1689_s25, %s1689_s25, %s1690_s26  }
  0x19   :  { %s101_s16 = sshll.u32 %s1699_s15, 4  ;;  %s121_s4 = sshll.u32 %s2018_s8, 4  ;;  %s102_s16 = int_to_ptr.vmem [resolvable:$true] %s101_s16  ;;  %s122_s4 = int_to_ptr.hbm [resolvable:$true] %s121_s4 }
  0x1a   :  { %104 = dma.hbm_to_vmem [thread:$0]  %s100_s2, 16, %s102_s16, [#allocation12]  }
  0x1b   :  { %s1700_s19 = smov [#allocation16]  }
  0x1c   :  { %s123_s20 = sshll.u32 %s1700_s19, 4  ;;  %s124_s20 = int_to_ptr.vmem [resolvable:$true] %s123_s20 }
  0x1d   :  { %126 = dma.hbm_to_vmem [thread:$0]  %s122_s4, 16, %s124_s20, [#allocation15]  }
  0x1e   :  { %1676 = dma.done.wait [#allocation3], 512  }
  0x1f   :  { %1677 = vsyncadd [#allocation3], 4294966784 }
  0x20   :  { %1678 = dma.done.wait [#allocation6], 1552  }
  0x21   :  { %1679 = vsyncadd [#allocation6], 4294965744 }
  0x22   :  { %1680 = dma.done.wait [#allocation9], 3088  }
  0x23   :  { %1681 = vsyncadd [#allocation9], 4294964208 }
  0x24   :  { %1682 = dma.done.wait [#allocation12], 32  }
  0x25   :  { %1683 = vsyncadd [#allocation12], 4294967264 }
  0x26   :  { %1684 = dma.done.wait [#allocation15], 144  }
  0x27   :  { %1685 = vsyncadd [#allocation15], 4294967152  ;;  %v1364_v0 = vld [vmem:[#allocation5 + $0x18] sm:$0xff]  ;;  %v1363_v3 = vld [vmem:[#allocation5 + $0x10] sm:$0xff]  ;;  %vm204_vm0 = vcmask 1040384   ;;  %vm277_vm3 = vcmask 523264  }
  0x28   :  { %v1372_v1 = vld [vmem:[#allocation5 + $0x58] sm:$0xff]  ;;  %335 = vmatpush.bf16.msra.mxu1 %v1364_v0  ;;  %v1371_v4 = vld [vmem:[#allocation5 + $0x50] sm:$0xff]  ;;  %v1362_v6 = vld [vmem:[#allocation5 + $0x8] sm:$0xff]  ;;  %vm205_vm1 = vsmask.f32 256  ;;  %vm354_vm4 = vcmask 1046528  }
  0x29   :  { %v1368_v2 = vld [vmem:[#allocation5 + $0x38] sm:$0xff]  ;;  %404 = vmatpush.bf16.msra.mxu2 %v1372_v1  ;;  %v1367_v5 = vld [vmem:[#allocation5 + $0x30] sm:$0xff]  ;;  %v1370_v7 = vld [vmem:[#allocation5 + $0x48] sm:$0xff]  ;;  %vm219_vm5 = vsmask.f32 7424  ;;  %s1701_s6 = smov 112  }
  0x2a   :  { %288 = vmatpush.bf16.msra.mxu0 %v1368_v2  ;;  %v168_v8 = vld [vmem:[#allocation2] sm:$0xff]  ;;  %v169_v9 = vld [vmem:[#allocation2 + $0x8] sm:$0xff]  ;;  %v170_v10 = vld [vmem:[#allocation2 + $0x10] sm:$0xff]  ;;  %s1702_s8 = smov 120   ;;  %s1703_s26 = smov 104   ;;  %vm869_vm6 = vcmask 1041409  }
  0x2b   :  { %v172_v11 = vpack.c.bf16 %v168_v8, %v168_v8  ;;  %v173_v12 = vpack.c.bf16 %v169_v9, %v169_v9  ;;  %v171_v13 = vld [vmem:[#allocation2 + $0x18] sm:$0xff]  ;;  %v174_v14 = vpack.c.bf16 %v170_v10, %v170_v10  ;;  %v1366_v16 = vld [vmem:[#allocation5 + $0x28] sm:$0xff]  ;;  %v1361_v22 = vld [vmem:[#allocation5] sm:$0xff]  ;;  %s1704_s5 = smov 80   ;;  %s1705_s21 = smov 88   ;;  %vm918_vm7 = vcmask 1047556  }
  0x2c   :  { %336 = vmatpush.bf16.msra.mxu1 %v1363_v3  ;;  %v175_v15 = vpack.c.bf16 %v171_v13, %v171_v13  ;;  %v1369_v23 = vld [vmem:[#allocation5 + $0x40] sm:$0xff]  ;;  %vm1813_vm2 = vmand %vm204_vm0, %vm205_vm1  ;;  %v1379_v61 = vld [vmem:[#allocation10 + $0x30] sm:$0xff]  ;;  %s1706_s22 = smov 72   ;;  %s1707_s23 = smov 48   ;;  %vm998_vm8 = vcmask 64512   ;;  %vm1144_vm13 = vcmask 130048  }
  0x2d   :  { %405 = vmatpush.bf16.msra.mxu2 %v1371_v4  ;;  %v180_v17 = vunpack.c.l.b16 %v172_v11  ;;  %v181_v18 = vunpack.c.l.b16 %v173_v12  ;;  %v182_v19 = vunpack.c.l.b16 %v174_v14  ;;  %v1365_v25 = vld [vmem:[#allocation5 + $0x20] sm:$0xff]  ;;  %v1395_v63 = vld [vmem:[#allocation10 + $0xb0] sm:$0xff]  ;;  %v1378_v0 = vld [vmem:[#allocation10 + $0x28] sm:$0xff]  ;;  %s1708_s7 = smov 56   ;;  %s1709_s28 = smov 40   ;;  %vm1146_vm14 = vcmask 195584  }
  0x2e   :  { %289 = vmatpush.bf16.msra.mxu0 %v1367_v5  ;;  %v183_v20 = vunpack.c.l.b16 %v175_v15  ;;  %v1380_v59 = vld [vmem:[#allocation10 + $0x38] sm:$0xff]  ;;  %v1387_v1 = vld [vmem:[#allocation10 + $0x70] sm:$0xff]  ;;  %v1394_v2 = vld [vmem:[#allocation10 + $0xa8] sm:$0xff]  ;;  %s1710_s29 = smov 16   ;;  %s1711_s0 = smov 24   ;;  %vm1148_vm15 = vcmask 261120  }
  0x2f   :  { %v184_v21 = vpack.c.b16 %v181_v18, %v180_v17  ;;  %v1396_v60 = vld [vmem:[#allocation10 + $0xb8] sm:$0xff]  ;;  %v1377_v3 = vld [vmem:[#allocation10 + $0x20] sm:$0xff]  ;;  %v1386_v4 = vld [vmem:[#allocation10 + $0x68] sm:$0xff]  ;;  %s1712_s1 = smov 96   ;;  %s1713_s30 = smov 32   ;;  %vm1150_vm0 = vcmask 326656  }
  0x30   :  { %337 = vmatpush.bf16.msra.mxu1 %v1362_v6  ;;  %v185_v24 = vpack.c.b16 %v183_v20, %v182_v19  ;;  %v1388_v62 = vld [vmem:[#allocation10 + $0x78] sm:$0xff]  ;;  %v1393_v5 = vld [vmem:[#allocation10 + $0xa0] sm:$0xff]  ;;  %v1375_v9 = vld [vmem:[#allocation10 + $0x10] sm:$0xff]  ;;  %vm1152_vm1 = vcmask 392192   ;;  %s1191_s15 = sshll.u32 %s2021_s11, 4  ;;  %s1192_s15 = int_to_ptr.hbm [resolvable:$true] %s1191_s15 }
  0x31   :  { %406 = vmatpush.bf16.msra.mxu2 %v1370_v7  ;;  %v187_v26 = vshrl.u32 %v184_v21, 16  ;;  %v190_v27 = vshll.u32 %v184_v21, 16  ;;  %586 = vmatpush.bf16.msra.mxu3 %v1388_v62  ;;  %v1376_v6 = vld [vmem:[#allocation10 + $0x18] sm:$0xff]  ;;  %v1385_v7 = vld [vmem:[#allocation10 + $0x60] sm:$0xff]  ;;  %v1391_v11 = vld [vmem:[#allocation10 + $0x90] sm:$0xff] }
  0x32   :  { %290 = vmatpush.bf16.msra.mxu0 %v1366_v16  ;;  %v194_v29 = vshrl.u32 %v185_v24, 16  ;;  %v197_v34 = vshll.u32 %v185_v24, 16  ;;  %v1392_v8 = vld [vmem:[#allocation10 + $0x98] sm:$0xff]  ;;  %v1374_v12 = vld [vmem:[#allocation10 + $0x8] sm:$0xff]  ;;  %v1383_v14 = vld [vmem:[#allocation10 + $0x50] sm:$0xff] }
  0x33   :  { %v189_v30 = vrot.slane %v187_v26, 7  ;;  %v1384_v10 = vld [vmem:[#allocation10 + $0x58] sm:$0xff]  ;;  %v1390_v15 = vld [vmem:[#allocation10 + $0x88] sm:$0xff]  ;;  %v1373_v16 = vld [vmem:[#allocation10] sm:$0xff] }
  0x34   :  { %338 = vmatpush.bf16.msra.mxu1 %v1361_v22  ;;  %v196_v33 = vrot.slane %v194_v29, 7  ;;  %v1382_v17 = vld [vmem:[#allocation10 + $0x48] sm:$0xff]  ;;  %v1389_v18 = vld [vmem:[#allocation10 + $0x80] sm:$0xff]  ;;  %v1426_v21 = vld [vmem:[#allocation7] ss:$0 sm:$0xff] }
  0x35   :  { %407 = vmatpush.bf16.msra.mxu2 %v1369_v23  ;;  %v192_v31 = vor.u32 %v190_v27, %v189_v30  ;;  %v209_v32 = vsel %vm1813_vm2, %v189_v30, 0  ;;  %587 = vmatpush.bf16.msra.mxu3 %v1387_v1  ;;  %v1381_v23 = vld [vmem:[#allocation10 + $0x40] sm:$0xff]  ;;  %v1427_v27 = vld [vmem:[#allocation8] ss:$0 sm:$0xff] }
  0x36   :  { %291 = vmatpush.bf16.msra.mxu0 %v1365_v25  ;;  %v356_v35 = vrot.slane %v209_v32, 1  ;;  %v228_v36 = vshll.u32 %v209_v32, 16  ;;  %v199_v41 = vor.u32 %v197_v34, %v196_v33  ;;  %v210_v48 = vsel %vm1813_vm2, %v196_v33, 0 }
  0x37   :  { %v207_v37 = vsel %vm1813_vm2, 0, %v192_v31  ;;  %v359_v50 = vrot.slane %v210_v48, 1  ;;  %v240_v54 = vshll.u32 %v210_v48, 16 }
  0x38   :  { %v221_v38 = vshrl.u32 %v207_v37, 16  ;;  %v223_v39 = vshll.u32 %v207_v37, 16  ;;  %1242 = vmatmul.msk.bf16.vlgmr.msra.gmra.mxu1 %vm277_vm3, %v207_v37  ;;  %v355_v40 = vrot.slane %v207_v37, 1  ;;  %v230_v44 = vrot.slane %v228_v36, 1 }
  0x39   :  { %v208_v46 = vsel %vm1813_vm2, 0, %v199_v41  ;;  %v242_v57 = vrot.slane %v240_v54, 1  ;;  %749 = vmatpush.bf16.msrb.mxu1 %v1396_v60  ;;  %588 = vmatpush.bf16.msra.mxu3 %v1386_v4 }
  0x3a   :  { %v225_v42 = vrot.slane %v223_v39, 1  ;;  %v357_v43 = vsel %vm354_vm4, %v355_v40, %v356_v35  ;;  %v235_v49 = vshll.u32 %v208_v46, 16  ;;  %v358_v51 = vrot.slane %v208_v46, 1  ;;  %653 = vmatpush.bf16.msrb.mxu0 %v1380_v59 }
  0x3b   :  { %1260 = vmatmul.msk.bf16.vlgmr.msra.gmra.mxu2 %vm277_vm3, %v357_v43  ;;  %v233_v52 = vshrl.u32 %v208_v46, 16 }
  0x3c   :  { %v226_v45 = vor.u32 %v225_v42, %v221_v38  ;;  %v237_v53 = vrot.slane %v235_v49, 1  ;;  %v360_v55 = vsel %vm354_vm4, %v358_v51, %v359_v50 }
  0x3d   :  { %750 = vmatpush.bf16.msrb.mxu1 %v1395_v63  ;;  %589 = vmatpush.bf16.msra.mxu3 %v1385_v7 }
  0x3e   :  { %v231_v47 = vsel %vm219_vm5, %v226_v45, %v230_v44  ;;  %v238_v56 = vor.u32 %v237_v53, %v233_v52  ;;  %654 = vmatpush.bf16.msrb.mxu0 %v1379_v61 }
  0x3f   :  { %1224 = vmatmul.msk.bf16.vlgmr.msra.gmra.mxu0 %vm277_vm3, %v231_v47 }
  0x40   :  { %v243_v58 = vsel %vm219_vm5, %v238_v56, %v242_v57 }
  0x41   :  { %751 = vmatpush.bf16.msrb.mxu1 %v1394_v2  ;;  %590 = vmatpush.bf16.msra.mxu3 %v1384_v10 }
  0x42   :  { %655 = vmatpush.bf16.msrb.mxu0 %v1378_v0 }
  0x45   :  { %752 = vmatpush.bf16.msrb.mxu1 %v1393_v5  ;;  %591 = vmatpush.bf16.msra.mxu3 %v1383_v14 }
  0x46   :  { %656 = vmatpush.bf16.msrb.mxu0 %v1377_v3 }
  0x48   :  { %1243 = vmatmul.msk.bf16.gmra.mxu1 %vm277_vm3, %v208_v46 }
  0x49   :  { %753 = vmatpush.bf16.msrb.mxu1 %v1392_v8  ;;  %592 = vmatpush.bf16.msra.mxu3 %v1382_v17 }
  0x4a   :  { %657 = vmatpush.bf16.msrb.mxu0 %v1376_v6 }
  0x4b   :  { %1261 = vmatmul.msk.bf16.gmra.mxu2 %vm277_vm3, %v360_v55 }
  0x4d   :  { %754 = vmatpush.bf16.msrb.mxu1 %v1391_v11  ;;  %593 = vmatpush.bf16.msra.mxu3 %v1381_v23 }
  0x4e   :  { %658 = vmatpush.bf16.msrb.mxu0 %v1375_v9 }
  0x4f   :  { %1225 = vmatmul.msk.bf16.gmra.mxu0 %vm277_vm3, %v243_v58 }
  0x51   :  { %755 = vmatpush.bf16.msrb.mxu1 %v1390_v15 }
  0x52   :  { %659 = vmatpush.bf16.msrb.mxu0 %v1374_v12 }
  0x55   :  { %756 = vmatpush.bf16.msrb.mxu1 %v1389_v18 }
  0x56   :  { %660 = vmatpush.bf16.msrb.mxu0 %v1373_v16 }
  0xb5   :  { %v340_v13 = vpop.f32.mrf.mxu1 }
  0xbc   :  { %v293_v19 = vpop.f32.mrf.mxu0 }
  0xbd   :  { %v341_v20 = vadd.f32 %v340_v13, %v293_v19  ;;  %v342_v25 = vpop.f32.mrf.mxu1 }
  0xbe   :  { %v409_v22 = vpop.f32.mrf.mxu2 }
  0xbf   :  { %v419_v24 = vadd.f32 %v409_v22, %v341_v20 }
  0xc1   :  { %v427_v26 = vmul.f32 %v1426_v21, %v419_v24 }
  0xc3   :  { %v435_v30 = vadd.f32 %v1427_v27, %v427_v26 }
  0xc4   :  { %v295_v29 = vpop.f32.mrf.mxu0 }
  0xc5   :  { %v343_v31 = vadd.f32 %v342_v25, %v295_v29  ;;  %v345_v34 = vpop.f32.mrf.mxu1  ;;  %v439_v35 = vmax.f32 %v435_v30, 0.0 }
  0xc6   :  { %v411_v32 = vpop.f32.mrf.mxu2 }
  0xc7   :  { %v420_v33 = vadd.f32 %v411_v32, %v343_v31  ;;  %v443_v39 = vpack.c.bf16 %v439_v35, %v439_v35 }
  0xc9   :  { %v428_v36 = vmul.f32 %v1426_v21, %v420_v33  ;;  %v451_v45 = vunpack.c.l.b16 %v443_v39 }
  0xcb   :  { %v436_v37 = vadd.f32 %v1427_v27, %v428_v36 }
  0xcc   :  { %v298_v38 = vpop.f32.mrf.mxu0 }
  0xcd   :  { %v440_v40 = vmax.f32 %v436_v37, 0.0  ;;  %v346_v41 = vadd.f32 %v345_v34, %v298_v38  ;;  %v347_v48 = vpop.f32.mrf.mxu1  ;;  %v1428_v38 = vld [vmem:[#allocation11] ss:$0 sm:$0xff] }
  0xce   :  { %v414_v42 = vpop.f32.mrf.mxu2 }
  0xcf   :  { %v444_v43 = vpack.c.bf16 %v440_v40, %v440_v40  ;;  %v421_v44 = vadd.f32 %v414_v42, %v346_v41  ;;  %v1429_v42 = vld [vmem:[#allocation13] ss:$0 sm:$0xff] }
  0xd1   :  { %v452_v46 = vunpack.c.l.b16 %v444_v43  ;;  %v429_v47 = vmul.f32 %v1426_v21, %v421_v44 }
  0xd3   :  { %v455_v49 = vpack.c.b16 %v452_v46, %v451_v45  ;;  %v437_v50 = vadd.f32 %v1427_v27, %v429_v47 }
  0xd4   :  { %v300_v51 = vpop.f32.mrf.mxu0 }
  0xd5   :  { %v348_v52 = vadd.f32 %v347_v48, %v300_v51  ;;  %v458_v53 = vshrl.u32 %v455_v49, 16  ;;  %v441_v55 = vmax.f32 %v437_v50, 0.0  ;;  %v461_v58 = vshll.u32 %v455_v49, 16 }
  0xd6   :  { %v416_v54 = vpop.f32.mrf.mxu2 }
  0xd7   :  { %v422_v56 = vadd.f32 %v416_v54, %v348_v52  ;;  %v460_v57 = vrot.slane %v458_v53, 7  ;;  %v445_v62 = vpack.c.bf16 %v441_v55, %v441_v55 }
  0xd9   :  { %v430_v59 = vmul.f32 %v1426_v21, %v422_v56  ;;  %v463_v60 = vor.u32 %v461_v58, %v460_v57  ;;  %v477_v61 = vsel %vm1813_vm2, %v460_v57, 0  ;;  %v453_v9 = vunpack.c.l.b16 %v445_v62 }
  0xda   :  { %v677_v2 = vrot.slane %v477_v61, 1  ;;  %v503_v4 = vshll.u32 %v477_v61, 16 }
  0xdb   :  { %v438_v63 = vadd.f32 %v1427_v27, %v430_v59  ;;  %v475_v0 = vsel %vm1813_vm2, 0, %v463_v60 }
  0xdc   :  { %661 = vmatmul.bf16.vlgmr.msrb.gmra.mxu0 %v475_v0  ;;  %v676_v1 = vrot.slane %v475_v0, 1  ;;  %v498_v3 = vshll.u32 %v475_v0, 16  ;;  %v496_v7 = vshrl.u32 %v475_v0, 16  ;;  %v505_v12 = vrot.slane %v503_v4, 1 }
  0xdd   :  { %v442_v5 = vmax.f32 %v438_v63, 0.0 }
  0xde   :  { %v678_v6 = vsel %vm354_vm4, %v676_v1, %v677_v2  ;;  %v500_v8 = vrot.slane %v498_v3, 1 }
  0xdf   :  { %v446_v10 = vpack.c.bf16 %v442_v5, %v442_v5  ;;  %757 = vmatmul.bf16.vlgmr.msrb.gmra.mxu1 %v678_v6 }
  0xe0   :  { %v501_v11 = vor.u32 %v500_v8, %v496_v7 }
  0xe1   :  { %v454_v13 = vunpack.c.l.b16 %v446_v10 }
  0xe2   :  { %v506_v14 = vsel %vm219_vm5, %v501_v11, %v505_v12 }
  0xe3   :  { %v456_v15 = vpack.c.b16 %v454_v13, %v453_v9  ;;  %594 = vmatmul.bf16.vlgmr.msra.gmra.mxu3 %v506_v14 }
  0xe5   :  { %v465_v16 = vshrl.u32 %v456_v15, 16  ;;  %v468_v17 = vshll.u32 %v456_v15, 16 }
  0xe7   :  { %v467_v18 = vrot.slane %v465_v16, 7 }
  0xe9   :  { %v470_v19 = vor.u32 %v468_v17, %v467_v18  ;;  %v478_v20 = vsel %vm1813_vm2, %v467_v18, 0 }
  0xea   :  { %v680_v21 = vrot.slane %v478_v20, 1  ;;  %v515_v22 = vshll.u32 %v478_v20, 16 }
  0xeb   :  { %v476_v23 = vsel %vm1813_vm2, 0, %v470_v19  ;;  %vm1154_vm2 = vcmask 457728  }
  0xec   :  { %666 = vmatmul.bf16.gmra.mxu0 %v476_v23  ;;  %v679_v24 = vrot.slane %v476_v23, 1  ;;  %v508_v25 = vshrl.u32 %v476_v23, 16  ;;  %v510_v26 = vshll.u32 %v476_v23, 16  ;;  %v517_v30 = vrot.slane %v515_v22, 1 }
  0xee   :  { %v681_v27 = vsel %vm354_vm4, %v679_v24, %v680_v21  ;;  %v512_v29 = vrot.slane %v510_v26, 1  ;;  %vm1157_vm4 = vcmask 588800  }
  0xef   :  { %762 = vmatmul.bf16.gmra.mxu1 %v681_v27 }
  0xf0   :  { %v513_v31 = vor.u32 %v512_v29, %v508_v25 }
  0xf2   :  { %v518_v32 = vsel %vm219_vm5, %v513_v31, %v517_v30  ;;  %vm1159_vm5 = vcmask 654336  }
  0xf3   :  { %599 = vmatmul.bf16.gmra.mxu3 %v518_v32 }
 0x159   :  { %v662_v33 = vpop.f32.mrf.mxu0 }
 0x15c   :  { %v758_v34 = vpop.f32.mrf.mxu1 }
 0x161   :  { %v664_v37 = vpop.f32.mrf.mxu0 }
 0x164   :  { %v760_v39 = vpop.f32.mrf.mxu1 }
 0x166   :  { %v595_v35 = vpop.f32.mrf.mxu3 }
 0x167   :  { %v663_v36 = vadd.f32 %v662_v33, %v595_v35 }
 0x169   :  { %v768_v28 = vadd.f32 %v758_v34, %v663_v36  ;;  %v667_v47 = vpop.f32.mrf.mxu0 }
 0x16b   :  { %v776_v41 = vmul.f32 %v1428_v38, %v768_v28 }
 0x16c   :  { %v763_v49 = vpop.f32.mrf.mxu1 }
 0x16d   :  { %v1847_v45 = vadd.f32 %v1429_v42, %v776_v41 }
 0x16e   :  { %v597_v40 = vpop.f32.mrf.mxu3 }
 0x16f   :  { %v665_v43 = vadd.f32 %v664_v37, %v597_v40  ;;  %v788_v51 = vmax.f32 %v1847_v45, 0.0 }
 0x171   :  { %v769_v44 = vadd.f32 %v760_v39, %v665_v43  ;;  %v669_v57 = vpop.f32.mrf.mxu0  ;;  %v1714_v39 = vmov 1983009808  }
 0x172   :  { %v921_v40 = vunpack.c.l.s4 %v1714_v39 }
 0x173   :  { %v777_v46 = vmul.f32 %v1428_v38, %v769_v44 }
 0x174   :  { %v765_v62 = vpop.f32.mrf.mxu1 }
 0x175   :  { %v1849_v48 = vadd.f32 %v1429_v42, %v777_v46 }
 0x176   :  { %v600_v50 = vpop.f32.mrf.mxu3 }
 0x177   :  { %v789_v52 = vmax.f32 %v1849_v48, 0.0  ;;  %v668_v55 = vadd.f32 %v667_v47, %v600_v50  ;;  %v1926_v47 = vunpack.c.0.s8 %v921_v40 }
 0x179   :  { %v792_v53 = vadd.f32 %v789_v52, %v788_v51  ;;  %v770_v60 = vadd.f32 %v763_v49, %v668_v55 }
 0x17b   :  { %v793_v54 = vrot.slane %v792_v53, 4  ;;  %v778_v2 = vmul.f32 %v1428_v38, %v770_v60 }
 0x17d   :  { %v794_v56 = vadd.f32 %v793_v54, %v792_v53  ;;  %v1861_v6 = vadd.f32 %v1429_v42, %v778_v2 }
 0x17e   :  { %v602_v58 = vpop.f32.mrf.mxu3 }
 0x17f   :  { %v795_v59 = vrot.slane %v794_v56, 2  ;;  %v670_v61 = vadd.f32 %v669_v57, %v602_v58  ;;  %v790_v8 = vmax.f32 %v1861_v6, 0.0  ;;  %v1019_v58 = vld [vmem:[#allocation14] sm:$0xff] }
 0x180   :  { %1044 = vmatpush.msrb.mxu2 %v1019_v58 }
 0x181   :  { %v796_v63 = vadd.f32 %v795_v59, %v794_v56  ;;  %v771_v0 = vadd.f32 %v765_v62, %v670_v61 }
 0x183   :  { %v797_v1 = vrot.slane %v796_v63, 1  ;;  %v779_v3 = vmul.f32 %v1428_v38, %v771_v0 }
 0x185   :  { %v1857_v4 = vadd.f32 %v797_v1, %v796_v63  ;;  %v1859_v5 = vadd.f32 %v1429_v42, %v779_v3 }
 0x187   :  { %812 = vrot.lane.b32.xlu2 %v1857_v4, %s1701_s6  ;;  %808 = vrot.lane.b32.xlu1 %v1857_v4, %s1702_s8  ;;  %v791_v7 = vmax.f32 %v1859_v5, 0.0 }
 0x188   :  { %816 = vrot.lane.b32.xlu0 %v1857_v4, %s1703_s26 }
 0x189   :  { %v799_v9 = vadd.f32 %v791_v7, %v790_v8 }
 0x18b   :  { %v800_v10 = vrot.slane %v799_v9, 4 }
 0x18d   :  { %v801_v11 = vadd.f32 %v800_v10, %v799_v9 }
 0x18f   :  { %828 = vrot.lane.b32.xlu2 %v1857_v4, %s1704_s5  ;;  %824 = vrot.lane.b32.xlu1 %v1857_v4, %s1705_s21  ;;  %v802_v12 = vrot.slane %v801_v11, 2 }
 0x190   :  { %832 = vrot.lane.b32.xlu0 %v1857_v4, %s1706_s22 }
 0x191   :  { %v803_v13 = vadd.f32 %v802_v12, %v801_v11 }
 0x193   :  { %v804_v14 = vrot.slane %v803_v13, 1 }
 0x195   :  { %v805_v15 = vadd.f32 %v804_v14, %v803_v13  ;;  %v1715_v13 = vmov 1934713408  }
 0x196   :  { %v945_v14 = vunpack.c.l.s4 %v1715_v13 }
 0x197   :  { %844 = vrot.lane.b32.xlu2 %v1857_v4, %s1707_s23  ;;  %840 = vrot.lane.b32.xlu1 %v1857_v4, %s1708_s7  ;;  %v868_v29 = vrot.slane %v805_v15, 7 }
 0x198   :  { %848 = vrot.lane.b32.xlu0 %v1857_v4, %s1709_s28 }
 0x199   :  { %v870_v33 = vsel %vm869_vm6, %v868_v29, %v1857_v4 }
 0x19f   :  { %860 = vrot.lane.b32.xlu2 %v1857_v4, %s1710_s29  ;;  %856 = vrot.lane.b32.xlu1 %v1857_v4, %s1711_s0 }
 0x1a0   :  { %864 = vrot.lane.b32.xlu0 %v1857_v4, %s1696_s27 }
 0x1a7   :  { %810 = vrot.lane.b32.xlu2 %v805_v15, %s1702_s8  ;;  %850 = vrot.lane.b32.xlu1 %v805_v15, %s1709_s28 }
 0x1a8   :  { %818 = vrot.lane.b32.xlu0 %v805_v15, %s1703_s26 }
 0x1af   :  { %814 = vrot.lane.b32.xlu2 %v805_v15, %s1701_s6  ;;  %866 = vrot.lane.b32.xlu1 %v805_v15, %s1696_s27 }
 0x1b0   :  { %834 = vrot.lane.b32.xlu0 %v805_v15, %s1706_s22 }
 0x1b7   :  { %830 = vrot.lane.b32.xlu2 %v805_v15, %s1704_s5  ;;  %826 = vrot.lane.b32.xlu1 %v805_v15, %s1705_s21 }
 0x1b8   :  { %822 = vrot.lane.b32.xlu0 %v805_v15, %s1712_s1 }
 0x1bf   :  { %846 = vrot.lane.b32.xlu2 %v805_v15, %s1707_s23  ;;  %842 = vrot.lane.b32.xlu1 %v805_v15, %s1708_s7 }
 0x1c0   :  { %838 = vrot.lane.b32.xlu0 %v805_v15, %s1689_s25 }
 0x1c7   :  { %862 = vrot.lane.b32.xlu2 %v805_v15, %s1710_s29  ;;  %858 = vrot.lane.b32.xlu1 %v805_v15, %s1711_s0 }
 0x1c8   :  { %854 = vrot.lane.b32.xlu0 %v805_v15, %s1713_s30 }
 0x1cf   :  { %852 = vrot.lane.b32.xlu2 %v1857_v4, %s1713_s30  ;;  %836 = vrot.lane.b32.xlu1 %v1857_v4, %s1689_s25 }
 0x1d0   :  { %820 = vrot.lane.b32.xlu0 %v1857_v4, %s1712_s1 }
 0x1e1   :  { %v813_v16 = vpop.permute.xlu2 %812 }
 0x1e9   :  { %v1914_v17 = vpop.permute.xlu2 %828 }
 0x1f1   :  { %v1916_v18 = vpop.permute.xlu2 %844 }
 0x1f9   :  { %v861_v19 = vpop.permute.xlu2 %860  ;;  %v809_v20 = vpop.permute.xlu1 %808 }
 0x1fa   :  { %v817_v21 = vpop.permute.xlu0 %816 }
 0x201   :  { %v1918_v22 = vpop.permute.xlu1 %824  ;;  %v811_v23 = vpop.permute.xlu2 %810 }
 0x202   :  { %v833_v24 = vpop.permute.xlu0 %832  ;;  %v871_v38 = vrot.slane %v811_v23, 7 }
 0x204   :  { %v872_v46 = vsel %vm869_vm6, %v871_v38, %v809_v20 }
 0x209   :  { %v841_v25 = vpop.permute.xlu1 %840  ;;  %v815_v26 = vpop.permute.xlu2 %814 }
 0x20a   :  { %v849_v27 = vpop.permute.xlu0 %848  ;;  %v873_v30 = vrot.slane %v815_v26, 7 }
 0x20c   :  { %v874_v31 = vsel %vm869_vm6, %v873_v30, %v813_v16 }
 0x20d   :  { %v917_v32 = vrot.slane %v874_v31, 4 }
 0x20f   :  { %v919_v34 = vsel %vm918_vm7, %v917_v32, %v870_v33 }
 0x210   :  { %v923_v55 = vperm.slane %v919_v34, %v1926_v47 }
 0x211   :  { %v857_v35 = vpop.permute.xlu1 %856  ;;  %v831_v43 = vpop.permute.xlu2 %830 }
 0x212   :  { %v865_v36 = vpop.permute.xlu0 %864 }
 0x219   :  { %v851_v37 = vpop.permute.xlu1 %850  ;;  %v847_v59 = vpop.permute.xlu2 %846 }
 0x21a   :  { %v819_v28 = vpop.permute.xlu0 %818  ;;  %v891_v1 = vrot.slane %v851_v37, 7  ;;  %v889_v23 = vrot.slane %v847_v59, 7 }
 0x21b   :  { %v875_v41 = vrot.slane %v819_v28, 7 }
 0x21c   :  { %v892_v11 = vsel %vm869_vm6, %v891_v1, %v849_v27 }
 0x21d   :  { %v876_v42 = vsel %vm869_vm6, %v875_v41, %v817_v21  ;;  %v881_v21 = vrot.slane %v831_v43, 7  ;;  %v964_v31 = vrot.slane %v892_v11, 4 }
 0x21e   :  { %v924_v44 = vrot.slane %v876_v42, 4  ;;  %v946_v42 = vunpack.c.0.s8 %v945_v14 }
 0x21f   :  { %v882_v41 = vsel %vm869_vm6, %v881_v21, %v1914_v17 }
 0x220   :  { %v925_v49 = vsel %vm918_vm7, %v924_v44, %v872_v46 }
 0x221   :  { %v929_v50 = vperm.slane %v925_v49, %v1926_v47  ;;  %v867_v53 = vpop.permute.xlu1 %866  ;;  %v863_v63 = vpop.permute.xlu2 %862 }
 0x222   :  { %v835_v54 = vpop.permute.xlu0 %834  ;;  %v899_v2 = vrot.slane %v867_v53, 7  ;;  %v897_v3 = vrot.slane %v863_v63, 7 }
 0x223   :  { %v942_v56 = vrot.slane %v929_v50, 4  ;;  %v883_v4 = vrot.slane %v835_v54, 7 }
 0x224   :  { %v900_v12 = vsel %vm869_vm6, %v899_v2, %v865_v36  ;;  %v898_v15 = vsel %vm869_vm6, %v897_v3, %v861_v19 }
 0x225   :  { %v943_v57 = vsel %vm918_vm7, %v942_v56, %v923_v55  ;;  %v884_v16 = vsel %vm869_vm6, %v883_v4, %v833_v24  ;;  %v976_v32 = vrot.slane %v900_v12, 4  ;;  %v970_v34 = vrot.slane %v898_v15, 4 }
 0x226   :  { %v936_v36 = vrot.slane %v884_v16, 4  ;;  %v930_v55 = vrot.slane %v882_v41, 4  ;;  %v947_v59 = vperm.slane %v943_v57, %v946_v42 }
 0x228   :  { %v956_v11 = vrot.slane %v947_v59, 4 }
 0x229   :  { %v827_v60 = vpop.permute.xlu1 %826  ;;  %v853_v37 = vpop.permute.xlu2 %852 }
 0x22a   :  { %v823_v61 = vpop.permute.xlu0 %822  ;;  %v879_v10 = vrot.slane %v827_v60, 7 }
 0x22b   :  { %v877_v53 = vrot.slane %v823_v61, 7 }
 0x22c   :  { %v880_v27 = vsel %vm869_vm6, %v879_v10, %v1918_v22 }
 0x22d   :  { %v937_v39 = vsel %vm918_vm7, %v936_v36, %v880_v27 }
 0x22e   :  { %v941_v50 = vperm.slane %v937_v39, %v1926_v47 }
 0x230   :  { %v948_v3 = vrot.slane %v941_v50, 4 }
 0x231   :  { %v843_v62 = vpop.permute.xlu1 %842 }
 0x232   :  { %v839_v0 = vpop.permute.xlu0 %838  ;;  %v887_v9 = vrot.slane %v843_v62, 7 }
 0x233   :  { %v885_v44 = vrot.slane %v839_v0, 7 }
 0x234   :  { %v888_v26 = vsel %vm869_vm6, %v887_v9, %v841_v25  ;;  %v890_v25 = vsel %vm869_vm6, %v889_v23, %v1916_v18 }
 0x235   :  { %v965_v24 = vsel %vm918_vm7, %v964_v31, %v888_v26  ;;  %v958_v49 = vrot.slane %v890_v25, 4 }
 0x236   :  { %v969_v43 = vperm.slane %v965_v24, %v1926_v47 }
 0x238   :  { %v982_v63 = vrot.slane %v969_v43, 4 }
 0x239   :  { %v859_v20 = vpop.permute.xlu1 %858 }
 0x23a   :  { %v895_v29 = vrot.slane %v859_v20, 7  ;;  %v855_v30 = vpop.permute.xlu0 %854 }
 0x23b   :  { %v893_v33 = vrot.slane %v855_v30, 7 }
 0x23c   :  { %v896_v19 = vsel %vm869_vm6, %v895_v29, %v857_v35  ;;  %v1050_v35 = vld [vmem:[%s2019_s9] sm:$0xff] }
 0x23d   :  { %v977_v28 = vsel %vm918_vm7, %v976_v32, %v896_v19  ;;  %v894_v38 = vsel %vm869_vm6, %v893_v33, %v853_v37  ;;  %1073 = vmatpush.msra.mxu2 %v1050_v35 }
 0x23e   :  { %v981_v40 = vperm.slane %v977_v28, %v1926_v47  ;;  %v971_v22 = vsel %vm918_vm7, %v970_v34, %v894_v38 }
 0x23f   :  { %v975_v18 = vperm.slane %v971_v22, %v1926_v47 }
 0x240   :  { %v988_v46 = vrot.slane %v981_v40, 4 }
 0x241   :  { %v837_v54 = vpop.permute.xlu1 %836 }
 0x242   :  { %v989_v17 = vsel %vm918_vm7, %v988_v46, %v975_v18  ;;  %v886_v56 = vsel %vm869_vm6, %v885_v44, %v837_v54  ;;  %v821_v58 = vpop.permute.xlu0 %820  ;;  %v1431_v46 = vld [vmem:[%s2020_s10] ss:$0 sm:$0xff]  ;;  %s1716_s10 = smov [#allocation17]  }
 0x243   :  { %v959_v60 = vsel %vm918_vm7, %v958_v49, %v886_v56  ;;  %v878_v62 = vsel %vm869_vm6, %v877_v53, %v821_v58  ;;  %v993_v0 = vperm.slane %v989_v17, %v946_v42 }
 0x244   :  { %v963_v1 = vperm.slane %v959_v60, %v1926_v47  ;;  %v931_v2 = vsel %vm918_vm7, %v930_v55, %v878_v62 }
 0x245   :  { %v935_v61 = vperm.slane %v931_v2, %v1926_v47  ;;  %v994_v57 = vrot.slane %v993_v0, 4 }
 0x246   :  { %v983_v4 = vsel %vm918_vm7, %v982_v63, %v963_v1 }
 0x247   :  { %v987_v9 = vperm.slane %v983_v4, %v946_v42  ;;  %v949_v10 = vsel %vm918_vm7, %v948_v3, %v935_v61 }
 0x248   :  { %v953_v12 = vperm.slane %v949_v10, %v946_v42  ;;  %v1430_v42 = vld [vmem:[#allocation16] ss:$0 sm:$0xff] }
 0x249   :  { %v996_v13 = vrot.slane %v987_v9, 4  ;;  %v995_v14 = vsel %vm918_vm7, %v994_v57, %v987_v9 }
 0x24a   :  { %v954_v15 = vrot.slane %v953_v12, 4  ;;  %v957_v16 = vsel %vm918_vm7, %v953_v12, %v956_v11  ;;  %v1000_v29 = vsel %vm998_vm8, %v995_v14, 0.0 }
 0x24b   :  { %v997_v20 = vsel %vm918_vm7, %v993_v0, %v996_v13  ;;  %v1008_v47 = vsel %vm998_vm8, %v957_v16, 0.0 }
 0x24c   :  { %v955_v21 = vsel %vm918_vm7, %v954_v15, %v947_v59  ;;  %v1009_v23 = vsel %vm998_vm8, %v997_v20, 0.0  ;;  %vm1163_vm7 = vcmask 785408  }
 0x24d   :  { %v999_v26 = vsel %vm998_vm8, %v955_v21, 0.0  ;;  %v1010_v30 = vadd.f32 %v1009_v23, %v1008_v47 }
 0x24e   :  { %v1001_v31 = vadd.f32 %v1000_v29, %v999_v26 }
 0x24f   :  { %v1011_v32 = vrot.slane %v1010_v30, 4 }
 0x250   :  { %v1002_v27 = vrot.slane %v1001_v31, 4 }
 0x251   :  { %v1012_v33 = vadd.f32 %v1011_v32, %v1010_v30 }
 0x252   :  { %v1003_v34 = vadd.f32 %v1002_v27, %v1001_v31 }
 0x253   :  { %v1013_v36 = vrot.slane %v1012_v33, 2 }
 0x254   :  { %v1004_v37 = vrot.slane %v1003_v34, 2 }
 0x255   :  { %v1014_v19 = vadd.f32 %v1013_v36, %v1012_v33 }
 0x256   :  { %v1005_v24 = vadd.f32 %v1004_v37, %v1003_v34 }
 0x257   :  { %v1015_v28 = vrot.slane %v1014_v19, 1 }
 0x258   :  { %v1006_v38 = vrot.slane %v1005_v24, 1 }
 0x259   :  { %v1016_v25 = vadd.f32 %v1015_v28, %v1014_v19 }
 0x25a   :  { %v1007_v39 = vadd.f32 %v1006_v38, %v1005_v24 }
 0x25b   :  { %v1018_v40 = vmul.f32 0.00390625, %v1016_v25 }
 0x25c   :  { %v1017_v22 = vmul.f32 0.00390625, %v1007_v39 }
 0x25e   :  { %v1026_v41 = vsel %vm869_vm6, %v1018_v40, %v1017_v22  ;;  %vm1161_vm6 = vcmask 719872  }
 0x25f   :  { %1358 = vmatmul.msk.f32.vlgmr.msrb.gmra.mxu2 %vm998_vm8, %v1026_v41 }
 0x2e2   :  { %v1046_v35 = vpop.f32.mrf.mxu2 }
 0x2e3   :  { %v1047_v43 = vadd.f32 %v1430_v42, %v1046_v35 }
 0x2e5   :  { %v1049_v44 = vmax.f32 %v1047_v43, 0.0 }
 0x2e7   :  { %1359 = vmatmul.msk.f32.vlgmr.msra.gmra.mxu2 %vm998_vm8, %v1049_v44 }
 0x36a   :  { %v1075_v18 = vpop.f32.mrf.mxu2 }
 0x36b   :  { %v1076_v49 = vadd.f32 %v1431_v46, %v1075_v18 }
 0x36d   :  { %v1360_v50 = vmul.f32 -1.442695, %v1076_v49 }
 0x36f   :  { %1432 = vpow2.f32 %v1360_v50 }
 0x375   :  { %v1433_v53 = vpop.eup %1432 }
 0x376   :  { %v1081_v54 = vadd.f32 1.0, %v1433_v53 }
 0x378   :  { %1434 = vrcp.f32 %v1081_v54  ;;  %v1093_v58 = vand.u32 2147483648, %v1081_v54  ;;  %v1091_v60 = vand.u32 2147483647, %v1081_v54  ;;  %vm1087_vm10 = vweird.f32 %v1081_v54 }
 0x37a   :  { %v1094_v63 = vor.u32 1.1754944e-38, %v1093_v58  ;;  %vm1092_vm12 = vcmp.eq.f32.partialorder %v1091_v60, 8.507059e+37 }
 0x37e   :  { %v1435_v55 = vpop.eup %1434 }
 0x37f   :  { %v1083_v17 = vmul.f32 %v1435_v55, %v1081_v54  ;;  %vm1088_vm9 = vweird.f32 %v1435_v55 }
 0x380   :  { %vm1089_vm11 = vmor %vm1087_vm10, %vm1088_vm9  ;;  %vm1167_vm9 = vcmask 916480   ;;  %vm1169_vm10 = vcmask 982016  }
 0x381   :  { %v1084_v56 = vsub.f32 1.0, %v1083_v17 }
 0x383   :  { %v1085_v59 = vmul.f32 %v1435_v55, %v1084_v56 }
 0x385   :  { %v1086_v62 = vadd.f32 %v1435_v55, %v1085_v59 }
 0x387   :  { %v1090_v0 = vsel %vm1089_vm11, %v1435_v55, %v1086_v62 }
 0x388   :  { %v1095_v1 = vsel %vm1092_vm12, %v1094_v63, %v1090_v0 }
 0x389   :  { %1104 = vrot.lane.b32.xlu2 %v1095_v1, %s1711_s0  ;;  %1101 = vrot.lane.b32.xlu1 %v1095_v1, %s1710_s29 }
 0x38a   :  { %1098 = vrot.lane.b32.xlu0 %v1095_v1, %s1696_s27 }
 0x391   :  { %1113 = vrot.lane.b32.xlu2 %v1095_v1, %s1707_s23  ;;  %1110 = vrot.lane.b32.xlu1 %v1095_v1, %s1709_s28 }
 0x392   :  { %1107 = vrot.lane.b32.xlu0 %v1095_v1, %s1713_s30 }
 0x399   :  { %1122 = vrot.lane.b32.xlu2 %v1095_v1, %s1706_s22  ;;  %1119 = vrot.lane.b32.xlu1 %v1095_v1, %s1689_s25  ;;  %s1189_s25 = sshll.u32 %s1716_s10, 4  ;;  %s1190_s25 = int_to_ptr.vmem [resolvable:$true] %s1189_s25 }
 0x39a   :  { %1116 = vrot.lane.b32.xlu0 %v1095_v1, %s1708_s7 }
 0x3a1   :  { %1131 = vrot.lane.b32.xlu2 %v1095_v1, %s1712_s1  ;;  %1128 = vrot.lane.b32.xlu1 %v1095_v1, %s1705_s21 }
 0x3a2   :  { %1125 = vrot.lane.b32.xlu0 %v1095_v1, %s1704_s5 }
 0x3a9   :  { %1140 = vrot.lane.b32.xlu2 %v1095_v1, %s1702_s8  ;;  %1137 = vrot.lane.b32.xlu1 %v1095_v1, %s1701_s6 }
 0x3aa   :  { %1134 = vrot.lane.b32.xlu0 %v1095_v1, %s1703_s26 }
 0x3e3   :  { %v1105_v2 = vpop.permute.xlu2 %1104 }
 0x3eb   :  { %v1114_v4 = vpop.permute.xlu2 %1113 }
 0x3f3   :  { %v1123_v14 = vpop.permute.xlu2 %1122 }
 0x3fb   :  { %v1102_v3 = vpop.permute.xlu1 %1101  ;;  %v1132_v29 = vpop.permute.xlu2 %1131 }
 0x3fc   :  { %v1099_v61 = vpop.permute.xlu0 %1098 }
 0x3fd   :  { %v1143_v9 = vsel %vm998_vm8, %v1095_v1, %v1099_v61  ;;  %vm1165_vm8 = vcmask 850944  }
 0x3fe   :  { %v1145_v11 = vsel %vm1144_vm13, %v1143_v9, %v1102_v3 }
 0x3ff   :  { %v1147_v12 = vsel %vm1146_vm14, %v1145_v11, %v1105_v2 }
 0x403   :  { %v1111_v10 = vpop.permute.xlu1 %1110  ;;  %v1141_v19 = vpop.permute.xlu2 %1140 }
 0x404   :  { %v1108_v57 = vpop.permute.xlu0 %1107 }
 0x405   :  { %v1149_v13 = vsel %vm1148_vm15, %v1147_v12, %v1108_v57 }
 0x406   :  { %v1151_v15 = vsel %vm1150_vm0, %v1149_v13, %v1111_v10 }
 0x407   :  { %v1153_v21 = vsel %vm1152_vm1, %v1151_v15, %v1114_v4 }
 0x40b   :  { %v1120_v16 = vpop.permute.xlu1 %1119 }
 0x40c   :  { %v1117_v20 = vpop.permute.xlu0 %1116 }
 0x40d   :  { %v1155_v47 = vsel %vm1154_vm2, %v1153_v21, %v1117_v20 }
 0x40e   :  { %v1156_v23 = vsel %vm277_vm3, %v1155_v47, %v1120_v16 }
 0x40f   :  { %v1158_v31 = vsel %vm1157_vm4, %v1156_v23, %v1123_v14 }
 0x413   :  { %v1129_v26 = vpop.permute.xlu1 %1128 }
 0x414   :  { %v1126_v30 = vpop.permute.xlu0 %1125 }
 0x415   :  { %v1160_v32 = vsel %vm1159_vm5, %v1158_v31, %v1126_v30 }
 0x416   :  { %v1162_v27 = vsel %vm1161_vm6, %v1160_v32, %v1129_v26 }
 0x417   :  { %v1164_v34 = vsel %vm1163_vm7, %v1162_v27, %v1132_v29 }
 0x41b   :  { %v1138_v33 = vpop.permute.xlu1 %1137 }
 0x41c   :  { %v1135_v36 = vpop.permute.xlu0 %1134 }
 0x41d   :  { %v1166_v37 = vsel %vm1165_vm8, %v1164_v34, %v1135_v36 }
 0x41e   :  { %v1168_v24 = vsel %vm1167_vm9, %v1166_v37, %v1138_v33 }
 0x41f   :  { %v1170_v28 = vsel %vm1169_vm10, %v1168_v24, %v1141_v19 }
 0x420   :  { %v1172_v38 = vrot.slane %v1170_v28, 1  ;;  %v1173_v25 = vperm.slane %v1170_v28, 0 }
 0x422   :  { %v1174_v39 = vperm.slane %v1172_v38, 0  ;;  %v1177_v40 = vmul.f32 %v1173_v25, %v788_v51  ;;  %v1178_v22 = vmul.f32 %v1173_v25, %v789_v52 }
 0x424   :  { %v1179_v41 = vmul.f32 %v1174_v39, %v790_v8  ;;  %v1180_v42 = vmul.f32 %v1174_v39, %v791_v7  ;;  %1181 = vst [vmem:[#allocation17] sm:$0xff] %v1177_v40 }
 0x425   :  { %1182 = vst [vmem:[#allocation17 + $0x8] sm:$0xff] %v1178_v22 }
 0x426   :  { %1183 = vst [vmem:[#allocation17 + $0x10] sm:$0xff] %v1179_v41 }
 0x427   :  { %1184 = vst [vmem:[#allocation17 + $0x18] sm:$0xff] %v1180_v42 }
 0x428   :  { %1197 = dma.vmem_to_hbm [thread:$0]  %s1190_s25, 512, %s1192_s15, [#allocation4], %s1695_s24, %s1695_s24, %s1696_s27  }
 0x429   :  { %1686 = dma.done.wait [#allocation4], 512  }
 0x42a   :  { %1687 = vsyncadd [#allocation4], 4294966784 }
 0x42b   :  { %1202 = vsyncpa [#allocation3], 1 }
 0x42c   :  { %1203 = vsyncpa [#allocation6], 1 }
 0x42d   :  { %1204 = vsyncpa [#allocation9], 1 }
 0x42e   :  { %1205 = vsyncpa [#allocation12], 1 }
 0x42f   :  { %1206 = vsyncpa [#allocation15], 1 }
 0x430   :  { %1207 = vsyncpa [#allocation4], 1 }

</bundles_post_ra>
